<compile_context>
chip_gen: v7x
topology: tpu7x:2x2x1
jax: 0.10.0
libtpu: 0.0.40
codegen_flags: <defaults>
</compile_context>

<pallas_src>
import jax
import jax.numpy as jnp
from jax.experimental import pallas as pl
from jax.experimental.pallas import tpu as pltpu

BN_EPS = 1e-5


def _bn_fold(y, gb):
    """Training-mode BatchNorm1d with the affine folded into scale/shift.

    y:  [N, F] pre-activation
    gb: [2, F] packed (gamma; beta)
    """
    n = y.shape[0]
    inv_n = 1.0 / n
    mean = jnp.sum(y, axis=0, keepdims=True) * inv_n                 # [1, F]
    centered = y - mean                                              # for var only
    var = jnp.sum(centered * centered, axis=0, keepdims=True) * inv_n
    scale = gb[0:1, :] * jax.lax.rsqrt(var + BN_EPS)                 # [1, F]
    shift = gb[1:2, :] - mean * scale                                # [1, F]
    return y * scale + shift                                         # 1 mul + 1 add on [N,F]


def _residual_block_kernel(x0_ref, w1_ref, w2_ref, bn1_ref, bn2_ref, o_ref):
    # x0: [N, D], w1: [D, H], w2: [H, D], bn1: [2, H], bn2: [2, D]
    x0 = x0_ref[...]

    # --- block1: Linear -> BN -> ReLU ---------------------------------------
    y = jnp.dot(x0, w1_ref[...], preferred_element_type=jnp.float32)
    x = jnp.maximum(_bn_fold(y, bn1_ref[...]), 0.0)

    # --- block2: Linear -> BN -> +x0 residual -> ReLU -----------------------
    y = jnp.dot(x, w2_ref[...], preferred_element_type=jnp.float32)
    o_ref[...] = jnp.maximum(_bn_fold(y, bn2_ref[...]) + x0, 0.0)


def pack_bn_params(gamma, beta):
    """Pack BatchNorm affine params into one [2, F] array.

    Call ONCE at parameter-init time (hoisted out of the per-forward path).
    """
    return jnp.stack([gamma, beta], axis=0).astype(jnp.float32)


def residual_block_forward(x0, w1, w2, bn1, bn2):
    """ResidualBlock forward.

    x0:  [N, D] float32                        (D = io_size)
    w1:  [D, H] float32  (block1 linear, [in, out] layout; x @ w1 == x @ W.T)
    w2:  [H, D] float32  (block2 linear, [in, out] layout)
    bn1: [2, H] float32  packed (gamma1; beta1)
    bn2: [2, D] float32  packed (gamma2; beta2)
    returns [N, D] float32
    """
    n, d = x0.shape
    h = w1.shape[1]
    assert w1.shape == (d, h) and w2.shape == (h, d)
    assert bn1.shape == (2, h) and bn2.shape == (2, d)

    # Static (trace-time) dtype guards; no-ops when params are already f32.
    if x0.dtype != jnp.float32:
        x0 = x0.astype(jnp.float32)
    if w1.dtype != jnp.float32:
        w1 = w1.astype(jnp.float32)
    if w2.dtype != jnp.float32:
        w2 = w2.astype(jnp.float32)

    vmem_spec = pl.BlockSpec(memory_space=pltpu.MemorySpace.VMEM)

    # Advisory cost so XLA can schedule neighbors around the custom call.
    flops = 2 * n * d * h + 2 * n * h * d + 8 * n * (d + h)
    bytes_accessed = 4 * (2 * n * d + 2 * d * h + 2 * h + 2 * d)
    cost = pl.CostEstimate(flops=flops,
                           transcendentals=h + d,        # two rsqrt rows
                           bytes_accessed=bytes_accessed)

    return pl.pallas_call(
        _residual_block_kernel,
        out_shape=jax.ShapeDtypeStruct((n, d), jnp.float32),
        in_specs=[vmem_spec] * 5,
        out_specs=vmem_spec,
        cost_estimate=cost,
        compiler_params=pltpu.CompilerParams(
            # Raise v5e's 16 MiB default scoped VMEM so the full-batch-resident
            # BN design scales uniformly across generations.
            vmem_limit_bytes=32 * 1024 * 1024,
        ),
    )(x0, w1, w2, bn1, bn2)


def _reference(x0, w1, gamma1, beta1, w2, gamma2, beta2):
    def bn(y, g, b):
        m = y.mean(axis=0, keepdims=True)
        v = ((y - m) ** 2).mean(axis=0, keepdims=True)
        return (y - m) / jnp.sqrt(v + BN_EPS) * g + b

    x = jax.nn.relu(bn(x0 @ w1, gamma1, beta1))
    return jax.nn.relu(bn(x @ w2, gamma2, beta2) + x0)


if __name__ == "__main__":
    key = jax.random.PRNGKey(0)
    k_x, k_w1, k_w2, k_g1, k_b1, k_g2, k_b2 = jax.random.split(key, 7)

    N = 128        # batch of graph nodes (>=128 rows amortizes fixed call overhead)
    D = 32         # io_size
    H = 32         # hidden_size (original module only runs when hidden == io)

    x0 = jax.random.normal(k_x, (N, D), dtype=jnp.float32)

    # kaiming_uniform-style init for the linear weights; bias dropped (it is a
    # no-op under training-mode BatchNorm).
    lim1 = jnp.sqrt(6.0 / D)
    w1 = jax.random.uniform(k_w1, (D, H), minval=-lim1, maxval=lim1, dtype=jnp.float32)
    lim2 = jnp.sqrt(6.0 / H)
    w2 = jax.random.uniform(k_w2, (H, D), minval=-lim2, maxval=lim2, dtype=jnp.float32)

    # Non-trivial (deterministic) BN affine params to exercise the packed path.
    gamma1 = 1.0 + 0.1 * jax.random.normal(k_g1, (H,), dtype=jnp.float32)
    beta1 = 0.1 * jax.random.normal(k_b1, (H,), dtype=jnp.float32)
    gamma2 = 1.0 + 0.1 * jax.random.normal(k_g2, (D,), dtype=jnp.float32)
    beta2 = 0.1 * jax.random.normal(k_b2, (D,), dtype=jnp.float32)

    # Parameter-init time packing (hoisted out of the per-forward path).
    bn1 = pack_bn_params(gamma1, beta1)
    bn2 = pack_bn_params(gamma2, beta2)

    # TODO(synk): BatchNorm1d running_mean/running_var buffer updates (training
    # bookkeeping) are not produced; only the forward output is computed.
    out = jax.block_until_ready(residual_block_forward(x0, w1, w2, bn1, bn2))
    ref = _reference(x0, w1, gamma1, beta1, w2, gamma2, beta2)

    assert out.shape == (N, D)
    assert jnp.allclose(out, ref, atol=1e-4, rtol=1e-5), float(
        jnp.max(jnp.abs(out - ref)))

    print("KERNEL_OK")
</pallas_src>

<mosaic_0001>
module attributes {stable_mosaic.version = 11 : i64} {
  func.func @_residual_block_kernel(%arg0: memref<128x32xf32, #tpu.memory_space<vmem>>, %arg1: memref<32x32xf32, #tpu.memory_space<vmem>>, %arg2: memref<32x32xf32, #tpu.memory_space<vmem>>, %arg3: memref<2x32xf32, #tpu.memory_space<vmem>>, %arg4: memref<2x32xf32, #tpu.memory_space<vmem>>, %arg5: memref<128x32xf32, #tpu.memory_space<vmem>>) attributes {dimension_semantics = [], scalar_prefetch = 0 : i64, scratch_operands = 0 : i64, tpu.core_type = #tpu.core_type<tc>} {
    %c0 = arith.constant 0 : index
    %c0_0 = arith.constant 0 : index
    %0 = vector.load %arg0[%c0, %c0_0] : memref<128x32xf32, #tpu.memory_space<vmem>>, vector<128x32xf32>
    %c0_1 = arith.constant 0 : index
    %c0_2 = arith.constant 0 : index
    %1 = vector.load %arg1[%c0_1, %c0_2] : memref<32x32xf32, #tpu.memory_space<vmem>>, vector<32x32xf32>
    %cst = arith.constant dense<0.000000e+00> : vector<128x32xf32>
    %2 = tpu.matmul %0, %1, %cst {dimension_numbers = #tpu.dot_dimension_numbers<[1], [0], [0], [1], [0, 0, 1, 1], [], []>} : vector<128x32xf32>, vector<32x32xf32>, vector<128x32xf32> -> vector<128x32xf32>
    %c0_3 = arith.constant 0 : index
    %c0_4 = arith.constant 0 : index
    %3 = vector.load %arg3[%c0_3, %c0_4] : memref<2x32xf32, #tpu.memory_space<vmem>>, vector<2x32xf32>
    %cst_5 = arith.constant dense<0.000000e+00> : vector<32xf32>
    %4 = vector.multi_reduction <add>, %2, %cst_5 [0] : vector<128x32xf32> to vector<32xf32>
    %5 = vector.shape_cast %4 : vector<32xf32> to vector<1x32xf32>
    %cst_6 = arith.constant 7.812500e-03 : f32
    %6 = vector.broadcast %cst_6 : f32 to vector<1x32xf32>
    %7 = arith.mulf %5, %6 : vector<1x32xf32>
    %8 = vector.broadcast %7 : vector<1x32xf32> to vector<128x32xf32>
    %9 = arith.subf %2, %8 : vector<128x32xf32>
    %10 = arith.mulf %9, %9 : vector<128x32xf32>
    %cst_7 = arith.constant dense<0.000000e+00> : vector<32xf32>
    %11 = vector.multi_reduction <add>, %10, %cst_7 [0] : vector<128x32xf32> to vector<32xf32>
    %12 = vector.shape_cast %11 : vector<32xf32> to vector<1x32xf32>
    %cst_8 = arith.constant 7.812500e-03 : f32
    %13 = vector.broadcast %cst_8 : f32 to vector<1x32xf32>
    %14 = arith.mulf %12, %13 : vector<1x32xf32>
    %15 = vector.extract_strided_slice %3 {offsets = [0, 0], sizes = [1, 32], strides = [1, 1]} : vector<2x32xf32> to vector<1x32xf32>
    %cst_9 = arith.constant 9.99999974E-6 : f32
    %16 = vector.broadcast %cst_9 : f32 to vector<1x32xf32>
    %17 = arith.addf %14, %16 : vector<1x32xf32>
    %18 = math.rsqrt %17 : vector<1x32xf32>
    %19 = arith.mulf %15, %18 : vector<1x32xf32>
    %20 = vector.extract_strided_slice %3 {offsets = [1, 0], sizes = [1, 32], strides = [1, 1]} : vector<2x32xf32> to vector<1x32xf32>
    %21 = arith.mulf %7, %19 : vector<1x32xf32>
    %22 = arith.subf %20, %21 : vector<1x32xf32>
    %23 = vector.broadcast %19 : vector<1x32xf32> to vector<128x32xf32>
    %24 = arith.mulf %2, %23 : vector<128x32xf32>
    %25 = vector.broadcast %22 : vector<1x32xf32> to vector<128x32xf32>
    %26 = arith.addf %24, %25 : vector<128x32xf32>
    %cst_10 = arith.constant 0.000000e+00 : f32
    %27 = vector.broadcast %cst_10 : f32 to vector<128x32xf32>
    %28 = arith.maximumf %26, %27 : vector<128x32xf32>
    %c0_11 = arith.constant 0 : index
    %c0_12 = arith.constant 0 : index
    %29 = vector.load %arg2[%c0_11, %c0_12] : memref<32x32xf32, #tpu.memory_space<vmem>>, vector<32x32xf32>
    %cst_13 = arith.constant dense<0.000000e+00> : vector<128x32xf32>
    %30 = tpu.matmul %28, %29, %cst_13 {dimension_numbers = #tpu.dot_dimension_numbers<[1], [0], [0], [1], [0, 0, 1, 1], [], []>} : vector<128x32xf32>, vector<32x32xf32>, vector<128x32xf32> -> vector<128x32xf32>
    %c0_14 = arith.constant 0 : index
    %c0_15 = arith.constant 0 : index
    %31 = vector.load %arg4[%c0_14, %c0_15] : memref<2x32xf32, #tpu.memory_space<vmem>>, vector<2x32xf32>
    %cst_16 = arith.constant dense<0.000000e+00> : vector<32xf32>
    %32 = vector.multi_reduction <add>, %30, %cst_16 [0] : vector<128x32xf32> to vector<32xf32>
    %33 = vector.shape_cast %32 : vector<32xf32> to vector<1x32xf32>
    %cst_17 = arith.constant 7.812500e-03 : f32
    %34 = vector.broadcast %cst_17 : f32 to vector<1x32xf32>
    %35 = arith.mulf %33, %34 : vector<1x32xf32>
    %36 = vector.broadcast %35 : vector<1x32xf32> to vector<128x32xf32>
    %37 = arith.subf %30, %36 : vector<128x32xf32>
    %38 = arith.mulf %37, %37 : vector<128x32xf32>
    %cst_18 = arith.constant dense<0.000000e+00> : vector<32xf32>
    %39 = vector.multi_reduction <add>, %38, %cst_18 [0] : vector<128x32xf32> to vector<32xf32>
    %40 = vector.shape_cast %39 : vector<32xf32> to vector<1x32xf32>
    %cst_19 = arith.constant 7.812500e-03 : f32
    %41 = vector.broadcast %cst_19 : f32 to vector<1x32xf32>
    %42 = arith.mulf %40, %41 : vector<1x32xf32>
    %43 = vector.extract_strided_slice %31 {offsets = [0, 0], sizes = [1, 32], strides = [1, 1]} : vector<2x32xf32> to vector<1x32xf32>
    %cst_20 = arith.constant 9.99999974E-6 : f32
    %44 = vector.broadcast %cst_20 : f32 to vector<1x32xf32>
    %45 = arith.addf %42, %44 : vector<1x32xf32>
    %46 = math.rsqrt %45 : vector<1x32xf32>
    %47 = arith.mulf %43, %46 : vector<1x32xf32>
    %48 = vector.extract_strided_slice %31 {offsets = [1, 0], sizes = [1, 32], strides = [1, 1]} : vector<2x32xf32> to vector<1x32xf32>
    %49 = arith.mulf %35, %47 : vector<1x32xf32>
    %50 = arith.subf %48, %49 : vector<1x32xf32>
    %51 = vector.broadcast %47 : vector<1x32xf32> to vector<128x32xf32>
    %52 = arith.mulf %30, %51 : vector<128x32xf32>
    %53 = vector.broadcast %50 : vector<1x32xf32> to vector<128x32xf32>
    %54 = arith.addf %52, %53 : vector<128x32xf32>
    %55 = arith.addf %54, %0 : vector<128x32xf32>
    %cst_21 = arith.constant 0.000000e+00 : f32
    %56 = vector.broadcast %cst_21 : f32 to vector<128x32xf32>
    %57 = arith.maximumf %55, %56 : vector<128x32xf32>
    %c0_22 = arith.constant 0 : index
    %c0_23 = arith.constant 0 : index
    %58 = vector.load %arg5[%c0_22, %c0_23] : memref<128x32xf32, #tpu.memory_space<vmem>>, vector<128x32xf32>
    tpu.vector_store %arg5[%c0_22, %c0_23], %57 {strides = array<i32>} : memref<128x32xf32, #tpu.memory_space<vmem>>, vector<128x32xf32>,
    return
  }
}

</mosaic_0001>

<bundles_post_ra>
// kernel: tpu_custom_call.1
= control target key start
LH: loop header
LB: loop body
LE: loop exit
PB: predicated region body
PF: predicated region fallthrough
CT: control target
= control target key end

     0   :  { %vm40_vm0 = vcmask 261120   ;;  %s1511_s1 = inlined_call_operand.vmem [shape: f32[32,32], index: 1, kind: input, shape index: {}]   ;;  %s1512_s0 = inlined_call_operand.vmem [shape: f32[128,32], index: 0, kind: input, shape index: {}]   ;;  %s1513_s2 = inlined_call_operand.vmem [shape: f32[32,32], index: 2, kind: input, shape index: {}]   ;;  %s1514_s3 = inlined_call_operand.vmem [shape: f32[2,32], index: 3, kind: input, shape index: {}]   ;;  %s1515_s4 = inlined_call_operand.vmem [shape: f32[2,32], index: 4, kind: input, shape index: {}]   ;;  %s1516_s5 = inlined_call_operand.vmem [shape: f32[128,32], index: 5, kind: output, shape index: {}]  }
   0x1   :  { %v36_v0 = vld [vmem:[%s1511_s1] sm:$0xff]  ;;  %v37_v1 = vld [vmem:[%s1511_s1 + $0x8] sm:$0xff]  ;;  %v38_v2 = vld [vmem:[%s1511_s1 + $0x10] sm:$0xff] }
   0x2   :  { %v949_v3 = vpack.c.bf16 %v37_v1, %v36_v0  ;;  %v39_v4 = vld [vmem:[%s1511_s1 + $0x18] sm:$0xff]  ;;  %v1014_v5 = vld [vmem:[%s1512_s0] sm:$0xff]  ;;  %v1021_v7 = vld [vmem:[%s1512_s0 + $0x8] sm:$0xff] }
   0x3   :  { %v953_v6 = vpack.c.bf16 %v39_v4, %v38_v2  ;;  %893 = vmatprep.mubr.msk.f32.mxu0 %vm40_vm0, %v1014_v5  ;;  %v1026_v8 = vld [vmem:[%s1512_s0 + $0x10] sm:$0xff]  ;;  %v1035_v9 = vld [vmem:[%s1512_s0 + $0x18] sm:$0xff]  ;;  %v1040_v10 = vld [vmem:[%s1512_s0 + $0x20] sm:$0xff] }
   0x4   :  { %950 = vmatprep.subr.bf16.mxu0 %v949_v3  ;;  %v1049_v11 = vld [vmem:[%s1512_s0 + $0x28] sm:$0xff]  ;;  %v1054_v12 = vld [vmem:[%s1512_s0 + $0x30] sm:$0xff]  ;;  %v1063_v13 = vld [vmem:[%s1512_s0 + $0x38] sm:$0xff] }
   0x5   :  { %952 = vmatpush3.bf16.msra.mxu0 %v949_v3  ;;  %v1068_v14 = vld [vmem:[%s1512_s0 + $0x40] sm:$0xff]  ;;  %v1077_v15 = vld [vmem:[%s1512_s0 + $0x48] sm:$0xff]  ;;  %v1082_v16 = vld [vmem:[%s1512_s0 + $0x50] sm:$0xff] }
   0x6   :  { %954 = vmatprep.subr.bf16.mxu0 %v953_v6  ;;  %v1091_v17 = vld [vmem:[%s1512_s0 + $0x58] sm:$0xff]  ;;  %v1096_v18 = vld [vmem:[%s1512_s0 + $0x60] sm:$0xff]  ;;  %v1105_v19 = vld [vmem:[%s1512_s0 + $0x68] sm:$0xff] }
   0x7   :  { %v1110_v20 = vld [vmem:[%s1512_s0 + $0x70] sm:$0xff]  ;;  %v1119_v21 = vld [vmem:[%s1512_s0 + $0x78] sm:$0xff]  ;;  %v407_v22 = vld [vmem:[%s1513_s2] sm:$0xff] }
   0x8   :  { %1520 = vst [vmem:[#allocation2_spill] sm:$0xff] %v1119_v21  ;;  %v408_v23 = vld [vmem:[%s1513_s2 + $0x8] sm:$0xff]  ;;  %v409_v25 = vld [vmem:[%s1513_s2 + $0x10] sm:$0xff]  ;;  %v410_v26 = vld [vmem:[%s1513_s2 + $0x18] sm:$0xff] }
   0x9   :  { %956 = vmatpush3.bf16.msra.mxu0 %v953_v6  ;;  %v957_v24 = vpack.c.bf16 %v408_v23, %v407_v22  ;;  %v961_v28 = vpack.c.bf16 %v410_v26, %v409_v25 }
   0xb   :  { %958 = vmatprep.subr.bf16.mxu1 %v957_v24 }
   0xc   :  { %894 = vmatmul.mubr.msk.f32.vlgmr.msra.gmra.mrb[0].mxu0 %vm40_vm0, %v1021_v7  ;;  %960 = vmatpush3.bf16.msra.mxu1 %v957_v24 }
   0xd   :  { %896 = vmatprep.mubr.msk.f32.mxu0 %vm40_vm0, %v1026_v8  ;;  %962 = vmatprep.subr.bf16.mxu1 %v961_v28 }
  0x10   :  { %897 = vmatmul.mubr.msk.f32.gmra.mrb[2].mxu0 %vm40_vm0, %v1035_v9  ;;  %964 = vmatpush3.bf16.msra.mxu1 %v961_v28 }
  0x11   :  { %899 = vmatprep.mubr.msk.f32.mxu0 %vm40_vm0, %v1040_v10 }
  0x14   :  { %900 = vmatmul.mubr.msk.f32.gmra.mrb[4].mxu0 %vm40_vm0, %v1049_v11 }
  0x15   :  { %902 = vmatprep.mubr.msk.f32.mxu0 %vm40_vm0, %v1054_v12 }
  0x18   :  { %903 = vmatmul.mubr.msk.f32.gmra.mrb[6].mxu0 %vm40_vm0, %v1063_v13 }
  0x19   :  { %905 = vmatprep.mubr.msk.f32.mxu0 %vm40_vm0, %v1068_v14 }
  0x1c   :  { %906 = vmatmul.mubr.msk.f32.gmra.mrb[8].mxu0 %vm40_vm0, %v1077_v15 }
  0x1d   :  { %908 = vmatprep.mubr.msk.f32.mxu0 %vm40_vm0, %v1082_v16 }
  0x20   :  { %909 = vmatmul.mubr.msk.f32.gmra.mrb[10].mxu0 %vm40_vm0, %v1091_v17 }
  0x21   :  { %911 = vmatprep.mubr.msk.f32.mxu0 %vm40_vm0, %v1096_v18 }
  0x24   :  { %912 = vmatmul.mubr.msk.f32.gmra.mrb[12].mxu0 %vm40_vm0, %v1105_v19 }
  0x25   :  { %914 = vmatprep.mubr.msk.f32.mxu0 %vm40_vm0, %v1110_v20 }
  0x28   :  { %915 = vmatmul.mubr.msk.f32.gmra.mrb[14].mxu0 %vm40_vm0, %v1119_v21 }
  0xdf   :  { %v1135_v27 = vpop.f32.mrb[0].mxu0 }
  0xe0   :  { %v236_v29 = vsel %vm40_vm0, %v1135_v27, 0.0  ;;  %v1139_v30 = vpop.f32.mrb[1].mxu0 }
  0xe1   :  { %v235_v31 = vsel %vm40_vm0, %v1139_v30, 0.0 }
  0xe2   :  { %v237_v32 = vadd.f32 %v236_v29, %v235_v31 }
  0xe3   :  { %v1143_v33 = vpop.f32.mrb[2].mxu0 }
  0xe4   :  { %v1145_v34 = vpop.f32.mrb[3].mxu0  ;;  %v240_v37 = vsel %vm40_vm0, %v1143_v33, 0.0 }
  0xe5   :  { %v238_v35 = vsel %vm40_vm0, %v1145_v34, 0.0 }
  0xe6   :  { %v239_v36 = vadd.f32 %v238_v35, %v237_v32 }
  0xe7   :  { %v1151_v38 = vpop.f32.mrb[4].mxu0 }
  0xe8   :  { %v1153_v39 = vpop.f32.mrb[5].mxu0  ;;  %v241_v40 = vadd.f32 %v240_v37, %v239_v36  ;;  %v244_v43 = vsel %vm40_vm0, %v1151_v38, 0.0 }
  0xe9   :  { %v242_v41 = vsel %vm40_vm0, %v1153_v39, 0.0 }
  0xea   :  { %v243_v42 = vadd.f32 %v242_v41, %v241_v40 }
  0xeb   :  { %v1159_v44 = vpop.f32.mrb[6].mxu0 }
  0xec   :  { %v1161_v45 = vpop.f32.mrb[7].mxu0  ;;  %v245_v46 = vadd.f32 %v244_v43, %v243_v42  ;;  %v248_v49 = vsel %vm40_vm0, %v1159_v44, 0.0 }
  0xed   :  { %v246_v47 = vsel %vm40_vm0, %v1161_v45, 0.0 }
  0xee   :  { %v247_v48 = vadd.f32 %v246_v47, %v245_v46 }
  0xef   :  { %v1167_v50 = vpop.f32.mrb[8].mxu0 }
  0xf0   :  { %v1169_v51 = vpop.f32.mrb[9].mxu0  ;;  %v249_v52 = vadd.f32 %v248_v49, %v247_v48  ;;  %v252_v55 = vsel %vm40_vm0, %v1167_v50, 0.0 }
  0xf1   :  { %v250_v53 = vsel %vm40_vm0, %v1169_v51, 0.0 }
  0xf2   :  { %v251_v54 = vadd.f32 %v250_v53, %v249_v52 }
  0xf3   :  { %v1175_v56 = vpop.f32.mrb[10].mxu0 }
  0xf4   :  { %v1177_v57 = vpop.f32.mrb[11].mxu0  ;;  %v253_v58 = vadd.f32 %v252_v55, %v251_v54  ;;  %v256_v61 = vsel %vm40_vm0, %v1175_v56, 0.0 }
  0xf5   :  { %v254_v59 = vsel %vm40_vm0, %v1177_v57, 0.0 }
  0xf6   :  { %v255_v60 = vadd.f32 %v254_v59, %v253_v58 }
  0xf7   :  { %v1183_v62 = vpop.f32.mrb[12].mxu0 }
  0xf8   :  { %v1185_v63 = vpop.f32.mrb[13].mxu0  ;;  %v257_v0 = vadd.f32 %v256_v61, %v255_v60  ;;  %v260_v3 = vsel %vm40_vm0, %v1183_v62, 0.0 }
  0xf9   :  { %v258_v1 = vsel %vm40_vm0, %v1185_v63, 0.0 }
  0xfa   :  { %v259_v2 = vadd.f32 %v258_v1, %v257_v0 }
  0xfb   :  { %v1191_v4 = vpop.f32.mrb[14].mxu0 }
  0xfc   :  { %v1193_v6 = vpop.f32.mrb[15].mxu0  ;;  %v261_v22 = vadd.f32 %v260_v3, %v259_v2  ;;  %v264_v25 = vsel %vm40_vm0, %v1191_v4, 0.0 }
  0xfd   :  { %v262_v23 = vsel %vm40_vm0, %v1193_v6, 0.0 }
  0xfe   :  { %v263_v24 = vadd.f32 %v262_v23, %v261_v22 }
 0x100   :  { %v265_v26 = vadd.f32 %v264_v25, %v263_v24 }
 0x102   :  { %v266_v28 = vrot.slane %v265_v26, 4 }
 0x104   :  { %v267_v29 = vadd.f32 %v266_v28, %v265_v26 }
 0x106   :  { %v268_v31 = vrot.slane %v267_v29, 2 }
 0x108   :  { %v269_v32 = vadd.f32 %v268_v31, %v267_v29 }
 0x10a   :  { %v270_v35 = vrot.slane %v269_v32, 1 }
 0x10c   :  { %v271_v36 = vadd.f32 %v270_v35, %v269_v32 }
 0x10e   :  { %v1199_v37 = vmul.f32 0.0078125, %v271_v36 }
 0x110   :  { %v273_v40 = vsub.f32 %v1139_v30, %v1199_v37  ;;  %v274_v41 = vsub.f32 %v1135_v27, %v1199_v37  ;;  %v275_v42 = vsub.f32 %v1145_v34, %v1199_v37  ;;  %v276_v43 = vsub.f32 %v1143_v33, %v1199_v37 }
 0x111   :  { %v277_v46 = vsub.f32 %v1153_v39, %v1199_v37  ;;  %v278_v47 = vsub.f32 %v1151_v38, %v1199_v37  ;;  %v279_v48 = vsub.f32 %v1161_v45, %v1199_v37  ;;  %v280_v49 = vsub.f32 %v1159_v44, %v1199_v37 }
 0x112   :  { %v281_v52 = vsub.f32 %v1169_v51, %v1199_v37  ;;  %v282_v53 = vsub.f32 %v1167_v50, %v1199_v37  ;;  %v283_v54 = vsub.f32 %v1177_v57, %v1199_v37  ;;  %v284_v55 = vsub.f32 %v1175_v56, %v1199_v37 }
 0x113   :  { %v285_v58 = vsub.f32 %v1185_v63, %v1199_v37  ;;  %v286_v59 = vsub.f32 %v1183_v62, %v1199_v37  ;;  %v287_v60 = vsub.f32 %v1193_v6, %v1199_v37  ;;  %v288_v61 = vsub.f32 %v1191_v4, %v1199_v37 }
 0x114   :  { %v289_v0 = vmul.f32 %v273_v40, %v273_v40  ;;  %v290_v1 = vmul.f32 %v274_v41, %v274_v41  ;;  %v291_v2 = vmul.f32 %v275_v42, %v275_v42  ;;  %v292_v3 = vmul.f32 %v276_v43, %v276_v43 }
 0x115   :  { %v293_v25 = vmul.f32 %v277_v46, %v277_v46  ;;  %v294_v29 = vmul.f32 %v278_v47, %v278_v47  ;;  %v295_v35 = vmul.f32 %v279_v48, %v279_v48  ;;  %v296_v41 = vmul.f32 %v280_v49, %v280_v49 }
 0x116   :  { %v305_v22 = vsel %vm40_vm0, %v289_v0, 0.0  ;;  %v306_v23 = vsel %vm40_vm0, %v290_v1, 0.0  ;;  %v308_v26 = vsel %vm40_vm0, %v291_v2, 0.0  ;;  %v310_v31 = vsel %vm40_vm0, %v292_v3, 0.0 }
 0x117   :  { %v307_v24 = vadd.f32 %v306_v23, %v305_v22  ;;  %v312_v36 = vsel %vm40_vm0, %v293_v25, 0.0  ;;  %v314_v42 = vsel %vm40_vm0, %v294_v29, 0.0  ;;  %v297_v0 = vmul.f32 %v281_v52, %v281_v52 }
 0x118   :  { %v316_v1 = vsel %vm40_vm0, %v295_v35, 0.0  ;;  %v298_v46 = vmul.f32 %v282_v53, %v282_v53  ;;  %v318_v2 = vsel %vm40_vm0, %v296_v41, 0.0  ;;  %v299_v47 = vmul.f32 %v283_v54, %v283_v54 }
 0x119   :  { %v309_v28 = vadd.f32 %v308_v26, %v307_v24  ;;  %v320_v3 = vsel %vm40_vm0, %v297_v0, 0.0  ;;  %v300_v48 = vmul.f32 %v284_v55, %v284_v55  ;;  %v301_v49 = vmul.f32 %v285_v58, %v285_v58 }
 0x11a   :  { %v322_v25 = vsel %vm40_vm0, %v298_v46, 0.0  ;;  %v302_v52 = vmul.f32 %v286_v59, %v286_v59  ;;  %v303_v53 = vmul.f32 %v287_v60, %v287_v60  ;;  %v304_v54 = vmul.f32 %v288_v61, %v288_v61 }
 0x11b   :  { %v311_v32 = vadd.f32 %v310_v31, %v309_v28  ;;  %v324_v28 = vsel %vm40_vm0, %v299_v47, 0.0  ;;  %v326_v31 = vsel %vm40_vm0, %v300_v48, 0.0  ;;  %v328_v35 = vsel %vm40_vm0, %v301_v49, 0.0 }
 0x11c   :  { %v332_v55 = vsel %vm40_vm0, %v303_v53, 0.0  ;;  %v334_v58 = vsel %vm40_vm0, %v304_v54, 0.0  ;;  %v351_v47 = vlaneseq }
 0x11d   :  { %v313_v40 = vadd.f32 %v312_v36, %v311_v32 }
 0x11e   :  { %v1249_v61 = vshrl.u32 %v351_v47, 7 }
 0x11f   :  { %v315_v43 = vadd.f32 %v314_v42, %v313_v40  ;;  %v330_v40 = vsel %vm40_vm0, %v302_v52, 0.0 }
 0x121   :  { %v317_v22 = vadd.f32 %v316_v1, %v315_v43 }
 0x123   :  { %v319_v23 = vadd.f32 %v318_v2, %v317_v22 }
 0x125   :  { %v321_v24 = vadd.f32 %v320_v3, %v319_v23  ;;  %v234_v3 = vld [vmem:[%s1514_s3] sm:$0x3] }
 0x127   :  { %v323_v26 = vadd.f32 %v322_v25, %v321_v24  ;;  %v1518_v24 = vsub.s32 0, %v1249_v61 }
 0x129   :  { %v325_v29 = vadd.f32 %v324_v28, %v323_v26  ;;  %v1517_v28 = vsub.s32 1, %v1249_v61 }
 0x12b   :  { %v327_v32 = vadd.f32 %v326_v31, %v325_v29 }
 0x12d   :  { %v329_v36 = vadd.f32 %v328_v35, %v327_v32 }
 0x12f   :  { %v331_v41 = vadd.f32 %v330_v40, %v329_v36 }
 0x131   :  { %v333_v42 = vadd.f32 %v332_v55, %v331_v41 }
 0x133   :  { %v335_v43 = vadd.f32 %v334_v58, %v333_v42 }
 0x135   :  { %v336_v0 = vrot.slane %v335_v43, 4 }
 0x137   :  { %v337_v1 = vadd.f32 %v336_v0, %v335_v43 }
 0x139   :  { %v338_v59 = vrot.slane %v337_v1, 2 }
 0x13b   :  { %v339_v22 = vadd.f32 %v338_v59, %v337_v1 }
 0x13d   :  { %v340_v46 = vrot.slane %v339_v22, 1 }
 0x13f   :  { %v341_v2 = vadd.f32 %v340_v46, %v339_v22 }
 0x141   :  { %v342_v60 = vmul.f32 0.0078125, %v341_v2 }
 0x143   :  { %v343_v23 = vadd.f32 1e-05, %v342_v60 }
 0x145   :  { %965 = vrsqrt.f32 %v343_v23 }
 0x14f   :  { %v966_v48 = vpop.eup %965 }
 0x150   :  { %v345_v25 = vmul.f32 %v966_v48, %v234_v3 }
 0x152   :  { %v346_v26 = vmul.f32 %v345_v25, %v1199_v37  ;;  %v354_v49 = vrot.slane %v345_v25, %v1518_v24 }
 0x154   :  { %v348_v29 = vrot.slane %v346_v26, 7  ;;  %v369_v52 = vmul.f32 %v354_v49, %v1193_v6  ;;  %v355_v31 = vmul.f32 %v354_v49, %v1139_v30  ;;  %v356_v32 = vmul.f32 %v1135_v27, %v354_v49 }
 0x155   :  { %v357_v53 = vmul.f32 %v354_v49, %v1145_v34  ;;  %v358_v35 = vmul.f32 %v1143_v33, %v354_v49  ;;  %v359_v36 = vmul.f32 %v354_v49, %v1153_v39  ;;  %v360_v37 = vmul.f32 %v1151_v38, %v354_v49 }
 0x156   :  { %v350_v54 = vsub.f32 %v234_v3, %v348_v29  ;;  %v361_v40 = vmul.f32 %v354_v49, %v1161_v45  ;;  %v362_v41 = vmul.f32 %v1159_v44, %v354_v49  ;;  %v363_v55 = vmul.f32 %v354_v49, %v1169_v51 }
 0x157   :  { %v364_v6 = vmul.f32 %v1167_v50, %v354_v49  ;;  %v365_v30 = vmul.f32 %v354_v49, %v1177_v57  ;;  %v366_v27 = vmul.f32 %v1175_v56, %v354_v49  ;;  %v367_v34 = vmul.f32 %v354_v49, %v1185_v63 }
 0x158   :  { %v374_v33 = vrot.slane %v350_v54, %v1517_v28  ;;  %v368_v38 = vmul.f32 %v1183_v62, %v354_v49  ;;  %v370_v39 = vmul.f32 %v1191_v4, %v354_v49 }
 0x15a   :  { %v389_v45 = vadd.f32 %v374_v33, %v369_v52  ;;  %v375_v42 = vadd.f32 %v374_v33, %v355_v31  ;;  %v376_v44 = vadd.f32 %v374_v33, %v356_v32  ;;  %v377_v58 = vadd.f32 %v374_v33, %v357_v53 }
 0x15b   :  { %v378_v51 = vadd.f32 %v374_v33, %v358_v35  ;;  %v379_v43 = vadd.f32 %v374_v33, %v359_v36  ;;  %v380_v50 = vadd.f32 %v374_v33, %v360_v37  ;;  %v381_v0 = vadd.f32 %v374_v33, %v361_v40 }
 0x15c   :  { %v391_v57 = vmax.f32 %v375_v42, 0.0  ;;  %v392_v1 = vmax.f32 %v376_v44, 0.0  ;;  %v393_v56 = vmax.f32 %v377_v58, 0.0  ;;  %v382_v63 = vadd.f32 %v374_v33, %v362_v41 }
 0x15d   :  { %v383_v59 = vadd.f32 %v374_v33, %v363_v55  ;;  %v384_v22 = vadd.f32 %v374_v33, %v364_v6  ;;  %v385_v46 = vadd.f32 %v374_v33, %v365_v30  ;;  %v386_v62 = vadd.f32 %v374_v33, %v366_v27 }
 0x15e   :  { %925 = vmatprep.mubr.msk.f32.mxu1 %vm40_vm0, %v391_v57  ;;  %v387_v4 = vadd.f32 %v374_v33, %v367_v34  ;;  %v388_v2 = vadd.f32 %v374_v33, %v368_v38  ;;  %v390_v60 = vadd.f32 %v374_v33, %v370_v39  ;;  %v394_v23 = vmax.f32 %v378_v51, 0.0 }
 0x15f   :  { %926 = vmatmul.mubr.msk.f32.vlgmr.msra.gmra.mrb[0].mxu1 %vm40_vm0, %v392_v1  ;;  %v395_v47 = vmax.f32 %v379_v43, 0.0  ;;  %v396_v3 = vmax.f32 %v380_v50, 0.0  ;;  %v397_v48 = vmax.f32 %v381_v0, 0.0  ;;  %v398_v25 = vmax.f32 %v382_v63, 0.0 }
 0x160   :  { %928 = vmatprep.mubr.msk.f32.mxu1 %vm40_vm0, %v393_v56  ;;  %v399_v26 = vmax.f32 %v383_v59, 0.0  ;;  %v400_v49 = vmax.f32 %v384_v22, 0.0  ;;  %v401_v29 = vmax.f32 %v385_v46, 0.0  ;;  %v402_v52 = vmax.f32 %v386_v62, 0.0 }
 0x161   :  { %v403_v31 = vmax.f32 %v387_v4, 0.0  ;;  %v404_v32 = vmax.f32 %v388_v2, 0.0  ;;  %v405_v53 = vmax.f32 %v389_v45, 0.0  ;;  %v406_v35 = vmax.f32 %v390_v60, 0.0 }
 0x163   :  { %929 = vmatmul.mubr.msk.f32.gmra.mrb[2].mxu1 %vm40_vm0, %v394_v23 }
 0x164   :  { %931 = vmatprep.mubr.msk.f32.mxu1 %vm40_vm0, %v395_v47 }
 0x167   :  { %932 = vmatmul.mubr.msk.f32.gmra.mrb[4].mxu1 %vm40_vm0, %v396_v3 }
 0x168   :  { %934 = vmatprep.mubr.msk.f32.mxu1 %vm40_vm0, %v397_v48 }
 0x16b   :  { %935 = vmatmul.mubr.msk.f32.gmra.mrb[6].mxu1 %vm40_vm0, %v398_v25 }
 0x16c   :  { %937 = vmatprep.mubr.msk.f32.mxu1 %vm40_vm0, %v399_v26 }
 0x16f   :  { %938 = vmatmul.mubr.msk.f32.gmra.mrb[8].mxu1 %vm40_vm0, %v400_v49 }
 0x170   :  { %940 = vmatprep.mubr.msk.f32.mxu1 %vm40_vm0, %v401_v29 }
 0x173   :  { %941 = vmatmul.mubr.msk.f32.gmra.mrb[10].mxu1 %vm40_vm0, %v402_v52 }
 0x174   :  { %943 = vmatprep.mubr.msk.f32.mxu1 %vm40_vm0, %v403_v31 }
 0x177   :  { %944 = vmatmul.mubr.msk.f32.gmra.mrb[12].mxu1 %vm40_vm0, %v404_v32 }
 0x178   :  { %946 = vmatprep.mubr.msk.f32.mxu1 %vm40_vm0, %v405_v53 }
 0x17b   :  { %947 = vmatmul.mubr.msk.f32.gmra.mrb[14].mxu1 %vm40_vm0, %v406_v35 }
 0x232   :  { %v1293_v36 = vpop.f32.mrb[0].mxu1 }
 0x233   :  { %v606_v37 = vsel %vm40_vm0, %v1293_v36, 0.0  ;;  %v1297_v54 = vpop.f32.mrb[1].mxu1 }
 0x234   :  { %v605_v40 = vsel %vm40_vm0, %v1297_v54, 0.0 }
 0x235   :  { %v607_v41 = vadd.f32 %v606_v37, %v605_v40 }
 0x236   :  { %v1301_v55 = vpop.f32.mrb[2].mxu1 }
 0x237   :  { %v1303_v6 = vpop.f32.mrb[3].mxu1  ;;  %v610_v34 = vsel %vm40_vm0, %v1301_v55, 0.0 }
 0x238   :  { %v608_v30 = vsel %vm40_vm0, %v1303_v6, 0.0 }
 0x239   :  { %v609_v27 = vadd.f32 %v608_v30, %v607_v41 }
 0x23a   :  { %v1309_v33 = vpop.f32.mrb[4].mxu1 }
 0x23b   :  { %v1311_v38 = vpop.f32.mrb[5].mxu1  ;;  %v611_v39 = vadd.f32 %v610_v34, %v609_v27  ;;  %v614_v44 = vsel %vm40_vm0, %v1309_v33, 0.0 }
 0x23c   :  { %v612_v45 = vsel %vm40_vm0, %v1311_v38, 0.0 }
 0x23d   :  { %v613_v42 = vadd.f32 %v612_v45, %v611_v39 }
 0x23e   :  { %v1317_v58 = vpop.f32.mrb[6].mxu1 }
 0x23f   :  { %v1319_v51 = vpop.f32.mrb[7].mxu1  ;;  %v615_v43 = vadd.f32 %v614_v44, %v613_v42  ;;  %v618_v57 = vsel %vm40_vm0, %v1317_v58, 0.0 }
 0x240   :  { %v616_v50 = vsel %vm40_vm0, %v1319_v51, 0.0 }
 0x241   :  { %v617_v0 = vadd.f32 %v616_v50, %v615_v43 }
 0x242   :  { %v1325_v1 = vpop.f32.mrb[8].mxu1 }
 0x243   :  { %v1327_v56 = vpop.f32.mrb[9].mxu1  ;;  %v619_v63 = vadd.f32 %v618_v57, %v617_v0  ;;  %v622_v46 = vsel %vm40_vm0, %v1325_v1, 0.0 }
 0x244   :  { %v620_v59 = vsel %vm40_vm0, %v1327_v56, 0.0 }
 0x245   :  { %v621_v22 = vadd.f32 %v620_v59, %v619_v63 }
 0x246   :  { %v1333_v62 = vpop.f32.mrb[10].mxu1 }
 0x247   :  { %v1335_v4 = vpop.f32.mrb[11].mxu1  ;;  %v623_v2 = vadd.f32 %v622_v46, %v621_v22  ;;  %v626_v47 = vsel %vm40_vm0, %v1333_v62, 0.0 }
 0x248   :  { %v624_v60 = vsel %vm40_vm0, %v1335_v4, 0.0 }
 0x249   :  { %v625_v23 = vadd.f32 %v624_v60, %v623_v2 }
 0x24a   :  { %v1341_v3 = vpop.f32.mrb[12].mxu1 }
 0x24b   :  { %v1343_v48 = vpop.f32.mrb[13].mxu1  ;;  %v627_v25 = vadd.f32 %v626_v47, %v625_v23  ;;  %v630_v29 = vsel %vm40_vm0, %v1341_v3, 0.0 }
 0x24c   :  { %v628_v26 = vsel %vm40_vm0, %v1343_v48, 0.0 }
 0x24d   :  { %v629_v49 = vadd.f32 %v628_v26, %v627_v25 }
 0x24e   :  { %v1349_v52 = vpop.f32.mrb[14].mxu1 }
 0x24f   :  { %v1351_v31 = vpop.f32.mrb[15].mxu1  ;;  %v631_v32 = vadd.f32 %v630_v29, %v629_v49  ;;  %v634_v37 = vsel %vm40_vm0, %v1349_v52, 0.0 }
 0x250   :  { %v632_v53 = vsel %vm40_vm0, %v1351_v31, 0.0 }
 0x251   :  { %v633_v35 = vadd.f32 %v632_v53, %v631_v32 }
 0x253   :  { %v635_v40 = vadd.f32 %v634_v37, %v633_v35 }
 0x255   :  { %v636_v41 = vrot.slane %v635_v40, 4 }
 0x257   :  { %v637_v30 = vadd.f32 %v636_v41, %v635_v40 }
 0x259   :  { %v638_v27 = vrot.slane %v637_v30, 2 }
 0x25b   :  { %v639_v34 = vadd.f32 %v638_v27, %v637_v30 }
 0x25d   :  { %v640_v39 = vrot.slane %v639_v34, 1 }
 0x25f   :  { %v641_v45 = vadd.f32 %v640_v39, %v639_v34 }
 0x261   :  { %v1357_v42 = vmul.f32 0.0078125, %v641_v45 }
 0x263   :  { %v643_v44 = vsub.f32 %v1297_v54, %v1357_v42  ;;  %v644_v43 = vsub.f32 %v1293_v36, %v1357_v42  ;;  %v645_v50 = vsub.f32 %v1303_v6, %v1357_v42  ;;  %v646_v0 = vsub.f32 %v1301_v55, %v1357_v42 }
 0x264   :  { %v647_v57 = vsub.f32 %v1311_v38, %v1357_v42  ;;  %v648_v63 = vsub.f32 %v1309_v33, %v1357_v42  ;;  %v649_v59 = vsub.f32 %v1319_v51, %v1357_v42  ;;  %v650_v22 = vsub.f32 %v1317_v58, %v1357_v42 }
 0x265   :  { %v651_v46 = vsub.f32 %v1327_v56, %v1357_v42  ;;  %v652_v2 = vsub.f32 %v1325_v1, %v1357_v42  ;;  %v653_v60 = vsub.f32 %v1335_v4, %v1357_v42  ;;  %v654_v23 = vsub.f32 %v1333_v62, %v1357_v42 }
 0x266   :  { %v655_v47 = vsub.f32 %v1343_v48, %v1357_v42  ;;  %v656_v25 = vsub.f32 %v1341_v3, %v1357_v42  ;;  %v657_v26 = vsub.f32 %v1351_v31, %v1357_v42  ;;  %v658_v49 = vsub.f32 %v1349_v52, %v1357_v42 }
 0x267   :  { %v659_v29 = vmul.f32 %v643_v44, %v643_v44  ;;  %v660_v32 = vmul.f32 %v644_v43, %v644_v43  ;;  %v661_v53 = vmul.f32 %v645_v50, %v645_v50  ;;  %v662_v35 = vmul.f32 %v646_v0, %v646_v0 }
 0x268   :  { %v663_v30 = vmul.f32 %v647_v57, %v647_v57  ;;  %v664_v39 = vmul.f32 %v648_v63, %v648_v63  ;;  %v665_v24 = vmul.f32 %v649_v59, %v649_v59  ;;  %v666_v43 = vmul.f32 %v650_v22, %v650_v22 }
 0x269   :  { %v675_v37 = vsel %vm40_vm0, %v659_v29, 0.0  ;;  %v676_v40 = vsel %vm40_vm0, %v660_v32, 0.0  ;;  %v678_v27 = vsel %vm40_vm0, %v661_v53, 0.0  ;;  %v680_v45 = vsel %vm40_vm0, %v662_v35, 0.0 }
 0x26a   :  { %v677_v41 = vadd.f32 %v676_v40, %v675_v37  ;;  %v682_v21 = vsel %vm40_vm0, %v663_v30, 0.0  ;;  %v684_v50 = vsel %vm40_vm0, %v664_v39, 0.0  ;;  %v667_v29 = vmul.f32 %v651_v46, %v651_v46 }
 0x26b   :  { %v686_v32 = vsel %vm40_vm0, %v665_v24, 0.0  ;;  %v668_v57 = vmul.f32 %v652_v2, %v652_v2  ;;  %v688_v53 = vsel %vm40_vm0, %v666_v43, 0.0  ;;  %v669_v63 = vmul.f32 %v653_v60, %v653_v60 }
 0x26c   :  { %v679_v34 = vadd.f32 %v678_v27, %v677_v41  ;;  %v690_v35 = vsel %vm40_vm0, %v667_v29, 0.0  ;;  %v670_v59 = vmul.f32 %v654_v23, %v654_v23  ;;  %v672_v46 = vmul.f32 %v656_v25, %v656_v25 }
 0x26d   :  { %v692_v30 = vsel %vm40_vm0, %v668_v57, 0.0  ;;  %v694_v22 = vsel %vm40_vm0, %v669_v63, 0.0  ;;  %v673_v2 = vmul.f32 %v657_v26, %v657_v26  ;;  %v674_v60 = vmul.f32 %v658_v49, %v658_v49  ;;  %v604_v49 = vld [vmem:[%s1515_s4] sm:$0x3] }
 0x26e   :  { %v681_v28 = vadd.f32 %v680_v45, %v679_v34  ;;  %v696_v24 = vsel %vm40_vm0, %v670_v59, 0.0  ;;  %v1521_v59 = vsub.s32 0, %v1249_v61 }
 0x26f   :  { %v702_v23 = vsel %vm40_vm0, %v673_v2, 0.0 }
 0x270   :  { %v683_v44 = vadd.f32 %v682_v21, %v681_v28  ;;  %v671_v28 = vmul.f32 %v655_v47, %v655_v47  ;;  %v704_v47 = vsel %vm40_vm0, %v674_v60, 0.0 }
 0x272   :  { %v685_v0 = vadd.f32 %v684_v50, %v683_v44  ;;  %v698_v39 = vsel %vm40_vm0, %v671_v28, 0.0  ;;  %v700_v44 = vsel %vm40_vm0, %v672_v46, 0.0 }
 0x274   :  { %v687_v37 = vadd.f32 %v686_v32, %v685_v0 }
 0x276   :  { %v689_v40 = vadd.f32 %v688_v53, %v687_v37 }
 0x278   :  { %v691_v41 = vadd.f32 %v690_v35, %v689_v40 }
 0x27a   :  { %v693_v21 = vadd.f32 %v692_v30, %v691_v41 }
 0x27c   :  { %v695_v27 = vadd.f32 %v694_v22, %v693_v21 }
 0x27e   :  { %v697_v34 = vadd.f32 %v696_v24, %v695_v27 }
 0x280   :  { %v699_v45 = vadd.f32 %v698_v39, %v697_v34 }
 0x282   :  { %v701_v43 = vadd.f32 %v700_v44, %v699_v45 }
 0x284   :  { %v703_v50 = vadd.f32 %v702_v23, %v701_v43 }
 0x286   :  { %v705_v0 = vadd.f32 %v704_v47, %v703_v50 }
 0x288   :  { %v706_v29 = vrot.slane %v705_v0, 4 }
 0x28a   :  { %v707_v32 = vadd.f32 %v706_v29, %v705_v0 }
 0x28c   :  { %v708_v25 = vrot.slane %v707_v32, 2 }
 0x28e   :  { %v709_v37 = vadd.f32 %v708_v25, %v707_v32 }
 0x290   :  { %v710_v57 = vrot.slane %v709_v37, 1 }
 0x292   :  { %v711_v53 = vadd.f32 %v710_v57, %v709_v37 }
 0x294   :  { %v712_v26 = vmul.f32 0.0078125, %v711_v53 }
 0x296   :  { %v713_v40 = vadd.f32 1e-05, %v712_v26 }
 0x298   :  { %967 = vrsqrt.f32 %v713_v40 }
 0x2a2   :  { %v968_v63 = vpop.eup %967 }
 0x2a3   :  { %v715_v35 = vmul.f32 %v968_v63, %v604_v49 }
 0x2a5   :  { %v716_v41 = vmul.f32 %v715_v35, %v1357_v42  ;;  %v724_v30 = vrot.slane %v715_v35, %v1521_v59 }
 0x2a7   :  { %v718_v21 = vrot.slane %v716_v41, 7  ;;  %v725_v28 = vmul.f32 %v724_v30, %v1297_v54  ;;  %v726_v22 = vmul.f32 %v1293_v36, %v724_v30  ;;  %v727_v27 = vmul.f32 %v724_v30, %v1303_v6  ;;  %v1523_v41 = vld [vmem:[#allocation2_spill] sm:$0xff] }
 0x2a8   :  { %v728_v46 = vmul.f32 %v1301_v55, %v724_v30  ;;  %v729_v24 = vmul.f32 %v724_v30, %v1311_v38  ;;  %v730_v34 = vmul.f32 %v1309_v33, %v724_v30  ;;  %v731_v2 = vmul.f32 %v724_v30, %v1319_v51 }
 0x2a9   :  { %v720_v39 = vsub.f32 %v604_v49, %v718_v21  ;;  %v732_v42 = vmul.f32 %v1317_v58, %v724_v30  ;;  %v733_v45 = vmul.f32 %v724_v30, %v1327_v56  ;;  %v734_v60 = vmul.f32 %v1325_v1, %v724_v30 }
 0x2aa   :  { %v735_v54 = vmul.f32 %v724_v30, %v1335_v4  ;;  %v736_v36 = vmul.f32 %v1333_v62, %v724_v30  ;;  %v737_v6 = vmul.f32 %v724_v30, %v1343_v48  ;;  %v738_v55 = vmul.f32 %v1341_v3, %v724_v30 }
 0x2ab   :  { %v739_v38 = vmul.f32 %v724_v30, %v1351_v31  ;;  %v740_v33 = vmul.f32 %v1349_v52, %v724_v30  ;;  %v1522_v51 = vsub.s32 1, %v1249_v61 }
 0x2ad   :  { %v744_v44 = vrot.slane %v720_v39, %v1522_v51 }
 0x2af   :  { %v745_v58 = vadd.f32 %v744_v44, %v725_v28  ;;  %v746_v43 = vadd.f32 %v744_v44, %v726_v22  ;;  %v747_v56 = vadd.f32 %v744_v44, %v727_v27  ;;  %v748_v23 = vadd.f32 %v744_v44, %v728_v46 }
 0x2b0   :  { %v749_v1 = vadd.f32 %v744_v44, %v729_v24  ;;  %v750_v50 = vadd.f32 %v744_v44, %v730_v34  ;;  %v751_v4 = vadd.f32 %v744_v44, %v731_v2  ;;  %v752_v47 = vadd.f32 %v744_v44, %v732_v42 }
 0x2b1   :  { %v753_v62 = vadd.f32 %v744_v44, %v733_v45  ;;  %v754_v0 = vadd.f32 %v744_v44, %v734_v60  ;;  %v755_v48 = vadd.f32 %v744_v44, %v735_v54  ;;  %v756_v29 = vadd.f32 %v744_v44, %v736_v36 }
 0x2b2   :  { %v757_v3 = vadd.f32 %v744_v44, %v737_v6  ;;  %v758_v32 = vadd.f32 %v744_v44, %v738_v55  ;;  %v759_v31 = vadd.f32 %v744_v44, %v739_v38  ;;  %v760_v25 = vadd.f32 %v744_v44, %v740_v33 }
 0x2b3   :  { %v761_v52 = vadd.f32 %v745_v58, %v1014_v5  ;;  %v762_v61 = vadd.f32 %v746_v43, %v1021_v7  ;;  %v763_v37 = vadd.f32 %v747_v56, %v1026_v8  ;;  %v764_v57 = vadd.f32 %v748_v23, %v1035_v9 }
 0x2b4   :  { %v765_v53 = vadd.f32 %v749_v1, %v1040_v10  ;;  %v766_v26 = vadd.f32 %v750_v50, %v1049_v11  ;;  %v767_v40 = vadd.f32 %v751_v4, %v1054_v12  ;;  %v768_v49 = vadd.f32 %v752_v47, %v1063_v13 }
 0x2b5   :  { %v769_v63 = vadd.f32 %v753_v62, %v1068_v14  ;;  %v770_v35 = vadd.f32 %v754_v0, %v1077_v15  ;;  %v771_v5 = vadd.f32 %v755_v48, %v1082_v16  ;;  %v772_v7 = vadd.f32 %v756_v29, %v1091_v17 }
 0x2b6   :  { %v773_v8 = vadd.f32 %v757_v3, %v1096_v18  ;;  %v774_v9 = vadd.f32 %v758_v32, %v1105_v19  ;;  %v775_v10 = vadd.f32 %v759_v31, %v1110_v20  ;;  %v776_v11 = vadd.f32 %v760_v25, %v1523_v41 }
 0x2b7   :  { %v777_v59 = vmax.f32 %v761_v52, 0.0  ;;  %v778_v12 = vmax.f32 %v762_v61, 0.0  ;;  %v779_v30 = vmax.f32 %v763_v37, 0.0  ;;  %v780_v13 = vmax.f32 %v764_v57, 0.0 }
 0x2b8   :  { %v781_v21 = vmax.f32 %v765_v53, 0.0  ;;  %v782_v14 = vmax.f32 %v766_v26, 0.0  ;;  %v783_v28 = vmax.f32 %v767_v40, 0.0  ;;  %v784_v15 = vmax.f32 %v768_v49, 0.0 }
 0x2b9   :  { %v785_v22 = vmax.f32 %v769_v63, 0.0  ;;  %v786_v16 = vmax.f32 %v770_v35, 0.0  ;;  %v787_v27 = vmax.f32 %v771_v5, 0.0  ;;  %v788_v17 = vmax.f32 %v772_v7, 0.0  ;;  %793 = vst.msk [vmem:[%s1516_s5] sm:$0xff] %vm40_vm0, %v777_v59  ;;  %794 = vst.msk [vmem:[%s1516_s5 + $0x8] sm:$0xff] %vm40_vm0, %v778_v12 }
 0x2ba   :  { %795 = vst.msk [vmem:[%s1516_s5 + $0x10] sm:$0xff] %vm40_vm0, %v779_v30  ;;  %796 = vst.msk [vmem:[%s1516_s5 + $0x18] sm:$0xff] %vm40_vm0, %v780_v13  ;;  %v789_v18 = vmax.f32 %v773_v8, 0.0  ;;  %v790_v19 = vmax.f32 %v774_v9, 0.0  ;;  %v791_v20 = vmax.f32 %v775_v10, 0.0  ;;  %v792_v46 = vmax.f32 %v776_v11, 0.0 }
 0x2bb   :  { %797 = vst.msk [vmem:[%s1516_s5 + $0x20] sm:$0xff] %vm40_vm0, %v781_v21  ;;  %798 = vst.msk [vmem:[%s1516_s5 + $0x28] sm:$0xff] %vm40_vm0, %v782_v14 }
 0x2bc   :  { %799 = vst.msk [vmem:[%s1516_s5 + $0x30] sm:$0xff] %vm40_vm0, %v783_v28  ;;  %800 = vst.msk [vmem:[%s1516_s5 + $0x38] sm:$0xff] %vm40_vm0, %v784_v15 }
 0x2bd   :  { %801 = vst.msk [vmem:[%s1516_s5 + $0x40] sm:$0xff] %vm40_vm0, %v785_v22  ;;  %802 = vst.msk [vmem:[%s1516_s5 + $0x48] sm:$0xff] %vm40_vm0, %v786_v16 }
 0x2be   :  { %803 = vst.msk [vmem:[%s1516_s5 + $0x50] sm:$0xff] %vm40_vm0, %v787_v27  ;;  %804 = vst.msk [vmem:[%s1516_s5 + $0x58] sm:$0xff] %vm40_vm0, %v788_v17 }
 0x2bf   :  { %805 = vst.msk [vmem:[%s1516_s5 + $0x60] sm:$0xff] %vm40_vm0, %v789_v18  ;;  %806 = vst.msk [vmem:[%s1516_s5 + $0x68] sm:$0xff] %vm40_vm0, %v790_v19 }
 0x2c0   :  { %807 = vst.msk [vmem:[%s1516_s5 + $0x70] sm:$0xff] %vm40_vm0, %v791_v20  ;;  %808 = vst.msk [vmem:[%s1516_s5 + $0x78] sm:$0xff] %vm40_vm0, %v792_v46 }

</bundles_post_ra>
